<compile_context>
chip_gen: v7x
topology: tpu7x:2x2x1
jax: 0.10.0
libtpu: 0.0.40
codegen_flags: <defaults>
</compile_context>

<pallas_src>
from functools import partial

import jax
import jax.numpy as jnp
from jax.experimental import pallas as pl
from jax.experimental.pallas import tpu as pltpu


def _round_up(n, m):
    return ((n + m - 1) // m) * m


def _mlp_kernel(x_ref, w1_ref, b1_ref, w2_ref, b2_ref, w3_ref, b3_ref,
                o_ref, h1_ref, h2_ref):
    # Layer 1: Linear(obs -> hidden) + ReLU   (bf16 inputs, f32 MXU accumulate)
    h1_ref[...] = jnp.maximum(
        jnp.dot(x_ref[...], w1_ref[...], preferred_element_type=jnp.float32)
        + b1_ref[...], 0.0)
    # Layer 2: Linear(hidden -> hidden) + ReLU
    h2_ref[...] = jnp.maximum(
        jnp.dot(h1_ref[...].astype(w2_ref.dtype), w2_ref[...],
                preferred_element_type=jnp.float32) + b2_ref[...], 0.0)
    # Layer 3: Linear(hidden -> act) + Tanh  (lane-dense padded output)
    o_ref[...] = jnp.tanh(
        jnp.dot(h2_ref[...].astype(w3_ref.dtype), w3_ref[...],
                preferred_element_type=jnp.float32) + b3_ref[...]
    ).astype(o_ref.dtype)


@partial(jax.jit, static_argnames=("block_b", "use_bf16"))
def mlp_forward(x, params, block_b=256, use_bf16=True):
    """x: (B, obs_dim) float32. params: dict of w1,b1,w2,b2,w3,b3 (logical shapes)."""
    B, obs_dim = x.shape
    hidden = params["w1"].shape[1]
    act_dim = params["w3"].shape[1]

    # Lane-aligned padded shapes.
    obs_p = _round_up(obs_dim, 128)
    hid_p = _round_up(hidden, 128)
    act_p = _round_up(act_dim, 128)
    tb = min(block_b, _round_up(B, 8))       # batch tile (sublane multiple of 8)
    b_p = _round_up(B, tb)

    cdtype = jnp.bfloat16 if use_bf16 else jnp.float32

    # Zero-pad inputs / params.  Zero padding is exact: padded lanes stay zero
    # through matmul/bias/ReLU and padded batch rows / act lanes are sliced off.
    x_p = jnp.zeros((b_p, obs_p), cdtype).at[:B, :obs_dim].set(x.astype(cdtype))
    w1 = jnp.zeros((obs_p, hid_p), cdtype).at[:obs_dim, :hidden].set(
        params["w1"].astype(cdtype))
    b1 = jnp.zeros((1, hid_p), jnp.float32).at[:, :hidden].set(params["b1"])
    w2 = jnp.zeros((hid_p, hid_p), cdtype).at[:hidden, :hidden].set(
        params["w2"].astype(cdtype))
    b2 = jnp.zeros((1, hid_p), jnp.float32).at[:, :hidden].set(params["b2"])
    w3 = jnp.zeros((hid_p, act_p), cdtype).at[:hidden, :act_dim].set(
        params["w3"].astype(cdtype))
    b3 = jnp.zeros((1, act_p), jnp.float32).at[:, :act_dim].set(params["b3"])

    dsize = jnp.dtype(cdtype).itemsize
    cost = pl.CostEstimate(
        flops=2 * b_p * (obs_p * hid_p + hid_p * hid_p + hid_p * act_p),
        transcendentals=b_p * act_p,
        bytes_accessed=(b_p * obs_p * dsize
                        + (obs_p * hid_p + hid_p * hid_p + hid_p * act_p) * dsize
                        + (hid_p + hid_p + act_p) * 4
                        + b_p * act_p * 4),
    )

    out_p = pl.pallas_call(
        _mlp_kernel,
        out_shape=jax.ShapeDtypeStruct((b_p, act_p), jnp.float32),
        grid=(b_p // tb,),
        in_specs=[
            pl.BlockSpec((tb, obs_p), lambda i: (i, 0)),     # x: batch-tiled
            pl.BlockSpec((obs_p, hid_p), lambda i: (0, 0)),  # w1: VMEM-resident
            pl.BlockSpec((1, hid_p), lambda i: (0, 0)),      # b1
            pl.BlockSpec((hid_p, hid_p), lambda i: (0, 0)),  # w2
            pl.BlockSpec((1, hid_p), lambda i: (0, 0)),      # b2
            pl.BlockSpec((hid_p, act_p), lambda i: (0, 0)),  # w3
            pl.BlockSpec((1, act_p), lambda i: (0, 0)),      # b3
        ],
        out_specs=pl.BlockSpec((tb, act_p), lambda i: (i, 0)),
        scratch_shapes=[
            pltpu.VMEM((tb, hid_p), jnp.float32),  # h1 staging (bounds vreg pressure)
            pltpu.VMEM((tb, hid_p), jnp.float32),  # h2 staging
        ],
        compiler_params=pltpu.CompilerParams(
            dimension_semantics=("parallel",),     # shard batch tiles on v7x's 2 TCs
            vmem_limit_bytes=32 * 1024 * 1024,     # safe on v5e/v6e/v7x, >> actual need
        ),
        cost_estimate=cost,
    )(x_p, w1, b1, w2, b2, w3, b3)

    return out_p[:B, :act_dim]


def _xavier_uniform(key, fan_in, fan_out, gain):
    bound = gain * jnp.sqrt(6.0 / (fan_in + fan_out))
    return jax.random.uniform(key, (fan_in, fan_out), jnp.float32,
                              minval=-bound, maxval=bound)


def init_mlp_params(key, obs_dim, act_dim, hidden_size):
    # Mirrors MLP._init_weights: xavier_uniform with ReLU gain (sqrt(2)), zero biases.
    gain = jnp.sqrt(2.0)
    k1, k2, k3 = jax.random.split(key, 3)
    return {
        "w1": _xavier_uniform(k1, obs_dim, hidden_size, gain),
        "b1": jnp.zeros((1, hidden_size), jnp.float32),
        "w2": _xavier_uniform(k2, hidden_size, hidden_size, gain),
        "b2": jnp.zeros((1, hidden_size), jnp.float32),
        "w3": _xavier_uniform(k3, hidden_size, act_dim, gain),
        "b3": jnp.zeros((1, act_dim), jnp.float32),
    }


def mlp_reference(x, params, use_bf16=True):
    """Pure-JAX reference with the same dtype policy as the kernel."""
    cdtype = jnp.bfloat16 if use_bf16 else jnp.float32
    h1 = jnp.maximum(
        jnp.dot(x.astype(cdtype), params["w1"].astype(cdtype),
                preferred_element_type=jnp.float32) + params["b1"], 0.0)
    h2 = jnp.maximum(
        jnp.dot(h1.astype(cdtype), params["w2"].astype(cdtype),
                preferred_element_type=jnp.float32) + params["b2"], 0.0)
    return jnp.tanh(
        jnp.dot(h2.astype(cdtype), params["w3"].astype(cdtype),
                preferred_element_type=jnp.float32) + params["b3"])


if __name__ == "__main__":
    obs_dim, act_dim, hidden_size, batch = 16, 4, 32, 8

    key = jax.random.PRNGKey(0)
    k_params, k_x = jax.random.split(key)
    params = init_mlp_params(k_params, obs_dim, act_dim, hidden_size)
    x = jax.random.normal(k_x, (batch, obs_dim), jnp.float32)

    out = jax.block_until_ready(mlp_forward(x, params))
    assert out.shape == (batch, act_dim)
    ref_bf16 = mlp_reference(x, params, use_bf16=True)
    ref_f32 = mlp_reference(x, params, use_bf16=False)
    assert jnp.allclose(out, ref_bf16, atol=1e-3, rtol=1e-3), "mismatch vs bf16 reference"
    assert jnp.allclose(out, ref_f32, atol=1e-1), "mismatch vs f32 reference"

    # Exercise the multi-tile grid + ragged-batch padding path as well.
    x_big = jax.random.normal(jax.random.PRNGKey(1), (272, obs_dim), jnp.float32)
    out_big = jax.block_until_ready(mlp_forward(x_big, params, block_b=128))
    ref_big = mlp_reference(x_big, params, use_bf16=True)
    assert out_big.shape == (272, act_dim)
    assert jnp.allclose(out_big, ref_big, atol=1e-3, rtol=1e-3), "mismatch (tiled path)"

    print("KERNEL_OK")
</pallas_src>

<mosaic_0001>
module attributes {stable_mosaic.version = 11 : i64} {
  func.func @_mlp_kernel(%arg0: i32, %arg1: memref<8x128xbf16, #tpu.memory_space<vmem>>, %arg2: memref<128x128xbf16, #tpu.memory_space<vmem>>, %arg3: memref<1x128xf32, #tpu.memory_space<vmem>>, %arg4: memref<128x128xbf16, #tpu.memory_space<vmem>>, %arg5: memref<1x128xf32, #tpu.memory_space<vmem>>, %arg6: memref<128x128xbf16, #tpu.memory_space<vmem>>, %arg7: memref<1x128xf32, #tpu.memory_space<vmem>>, %arg8: memref<8x128xf32, #tpu.memory_space<vmem>>, %arg9: memref<8x128xf32, #tpu.memory_space<vmem>>, %arg10: memref<8x128xf32, #tpu.memory_space<vmem>>) attributes {dimension_semantics = [#tpu.dimension_semantics<parallel>], iteration_bounds = array<i64: 1>, scalar_prefetch = 0 : i64, scratch_operands = 2 : i64, tpu.core_type = #tpu.core_type<tc>, window_params = [{transform_indices = @transform_0, window_bounds = array<i64: 8, 128>}, {pipeline_mode = #tpu.pipeline_mode<synchronous>, transform_indices = @transform_1, window_bounds = array<i64: 128, 128>}, {pipeline_mode = #tpu.pipeline_mode<synchronous>, transform_indices = @transform_2, window_bounds = array<i64: 1, 128>}, {pipeline_mode = #tpu.pipeline_mode<synchronous>, transform_indices = @transform_3, window_bounds = array<i64: 128, 128>}, {pipeline_mode = #tpu.pipeline_mode<synchronous>, transform_indices = @transform_4, window_bounds = array<i64: 1, 128>}, {pipeline_mode = #tpu.pipeline_mode<synchronous>, transform_indices = @transform_5, window_bounds = array<i64: 128, 128>}, {pipeline_mode = #tpu.pipeline_mode<synchronous>, transform_indices = @transform_6, window_bounds = array<i64: 1, 128>}, {transform_indices = @transform_7, window_bounds = array<i64: 8, 128>}]} {
    %c0 = arith.constant 0 : index
    %c0_0 = arith.constant 0 : index
    %0 = vector.load %arg1[%c0, %c0_0] : memref<8x128xbf16, #tpu.memory_space<vmem>>, vector<8x128xbf16>
    %c0_1 = arith.constant 0 : index
    %c0_2 = arith.constant 0 : index
    %1 = vector.load %arg2[%c0_1, %c0_2] : memref<128x128xbf16, #tpu.memory_space<vmem>>, vector<128x128xbf16>
    %cst = arith.constant dense<0.000000e+00> : vector<8x128xf32>
    %2 = tpu.matmul %0, %1, %cst {dimension_numbers = #tpu.dot_dimension_numbers<[1], [0], [0], [1], [0, 0, 1, 1], [], []>} : vector<8x128xbf16>, vector<128x128xbf16>, vector<8x128xf32> -> vector<8x128xf32>
    %c0_3 = arith.constant 0 : index
    %c0_4 = arith.constant 0 : index
    %3 = vector.load %arg3[%c0_3, %c0_4] : memref<1x128xf32, #tpu.memory_space<vmem>>, vector<1x128xf32>
    %4 = vector.broadcast %3 : vector<1x128xf32> to vector<8x128xf32>
    %5 = arith.addf %2, %4 : vector<8x128xf32>
    %cst_5 = arith.constant 0.000000e+00 : f32
    %6 = vector.broadcast %cst_5 : f32 to vector<8x128xf32>
    %7 = arith.maximumf %5, %6 : vector<8x128xf32>
    %c0_6 = arith.constant 0 : index
    %c0_7 = arith.constant 0 : index
    %8 = vector.load %arg9[%c0_6, %c0_7] : memref<8x128xf32, #tpu.memory_space<vmem>>, vector<8x128xf32>
    tpu.vector_store %arg9[%c0_6, %c0_7], %7 {strides = array<i32>} : memref<8x128xf32, #tpu.memory_space<vmem>>, vector<8x128xf32>,
    %c0_8 = arith.constant 0 : index
    %c0_9 = arith.constant 0 : index
    %9 = vector.load %arg9[%c0_8, %c0_9] : memref<8x128xf32, #tpu.memory_space<vmem>>, vector<8x128xf32>
    %10 = arith.truncf %9 : vector<8x128xf32> to vector<8x128xbf16>
    %c0_10 = arith.constant 0 : index
    %c0_11 = arith.constant 0 : index
    %11 = vector.load %arg4[%c0_10, %c0_11] : memref<128x128xbf16, #tpu.memory_space<vmem>>, vector<128x128xbf16>
    %cst_12 = arith.constant dense<0.000000e+00> : vector<8x128xf32>
    %12 = tpu.matmul %10, %11, %cst_12 {dimension_numbers = #tpu.dot_dimension_numbers<[1], [0], [0], [1], [0, 0, 1, 1], [], []>} : vector<8x128xbf16>, vector<128x128xbf16>, vector<8x128xf32> -> vector<8x128xf32>
    %c0_13 = arith.constant 0 : index
    %c0_14 = arith.constant 0 : index
    %13 = vector.load %arg5[%c0_13, %c0_14] : memref<1x128xf32, #tpu.memory_space<vmem>>, vector<1x128xf32>
    %14 = vector.broadcast %13 : vector<1x128xf32> to vector<8x128xf32>
    %15 = arith.addf %12, %14 : vector<8x128xf32>
    %cst_15 = arith.constant 0.000000e+00 : f32
    %16 = vector.broadcast %cst_15 : f32 to vector<8x128xf32>
    %17 = arith.maximumf %15, %16 : vector<8x128xf32>
    %c0_16 = arith.constant 0 : index
    %c0_17 = arith.constant 0 : index
    %18 = vector.load %arg10[%c0_16, %c0_17] : memref<8x128xf32, #tpu.memory_space<vmem>>, vector<8x128xf32>
    tpu.vector_store %arg10[%c0_16, %c0_17], %17 {strides = array<i32>} : memref<8x128xf32, #tpu.memory_space<vmem>>, vector<8x128xf32>,
    %c0_18 = arith.constant 0 : index
    %c0_19 = arith.constant 0 : index
    %19 = vector.load %arg10[%c0_18, %c0_19] : memref<8x128xf32, #tpu.memory_space<vmem>>, vector<8x128xf32>
    %20 = arith.truncf %19 : vector<8x128xf32> to vector<8x128xbf16>
    %c0_20 = arith.constant 0 : index
    %c0_21 = arith.constant 0 : index
    %21 = vector.load %arg6[%c0_20, %c0_21] : memref<128x128xbf16, #tpu.memory_space<vmem>>, vector<128x128xbf16>
    %cst_22 = arith.constant dense<0.000000e+00> : vector<8x128xf32>
    %22 = tpu.matmul %20, %21, %cst_22 {dimension_numbers = #tpu.dot_dimension_numbers<[1], [0], [0], [1], [0, 0, 1, 1], [], []>} : vector<8x128xbf16>, vector<128x128xbf16>, vector<8x128xf32> -> vector<8x128xf32>
    %c0_23 = arith.constant 0 : index
    %c0_24 = arith.constant 0 : index
    %23 = vector.load %arg7[%c0_23, %c0_24] : memref<1x128xf32, #tpu.memory_space<vmem>>, vector<1x128xf32>
    %24 = vector.broadcast %23 : vector<1x128xf32> to vector<8x128xf32>
    %25 = arith.addf %22, %24 : vector<8x128xf32>
    %26 = math.tanh %25 : vector<8x128xf32>
    %c0_25 = arith.constant 0 : index
    %c0_26 = arith.constant 0 : index
    %27 = vector.load %arg8[%c0_25, %c0_26] : memref<8x128xf32, #tpu.memory_space<vmem>>, vector<8x128xf32>
    tpu.vector_store %arg8[%c0_25, %c0_26], %26 {strides = array<i32>} : memref<8x128xf32, #tpu.memory_space<vmem>>, vector<8x128xf32>,
    return
  }
  func.func @transform_0(%arg0: i32) -> (i32, i32) {
    %c0_i32 = arith.constant 0 : i32
    %c0_i32_0 = arith.constant 0 : i32
    return %arg0, %c0_i32 : i32, i32
  }
  func.func @transform_1(%arg0: i32) -> (i32, i32) {
    %c0_i32 = arith.constant 0 : i32
    %c0_i32_0 = arith.constant 0 : i32
    %c0_i32_1 = arith.constant 0 : i32
    return %c0_i32, %c0_i32_0 : i32, i32
  }
  func.func @transform_2(%arg0: i32) -> (i32, i32) {
    %c0_i32 = arith.constant 0 : i32
    %c0_i32_0 = arith.constant 0 : i32
    %c0_i32_1 = arith.constant 0 : i32
    return %c0_i32, %c0_i32_0 : i32, i32
  }
  func.func @transform_3(%arg0: i32) -> (i32, i32) {
    %c0_i32 = arith.constant 0 : i32
    %c0_i32_0 = arith.constant 0 : i32
    %c0_i32_1 = arith.constant 0 : i32
    return %c0_i32, %c0_i32_0 : i32, i32
  }
  func.func @transform_4(%arg0: i32) -> (i32, i32) {
    %c0_i32 = arith.constant 0 : i32
    %c0_i32_0 = arith.constant 0 : i32
    %c0_i32_1 = arith.constant 0 : i32
    return %c0_i32, %c0_i32_0 : i32, i32
  }
  func.func @transform_5(%arg0: i32) -> (i32, i32) {
    %c0_i32 = arith.constant 0 : i32
    %c0_i32_0 = arith.constant 0 : i32
    %c0_i32_1 = arith.constant 0 : i32
    return %c0_i32, %c0_i32_0 : i32, i32
  }
  func.func @transform_6(%arg0: i32) -> (i32, i32) {
    %c0_i32 = arith.constant 0 : i32
    %c0_i32_0 = arith.constant 0 : i32
    %c0_i32_1 = arith.constant 0 : i32
    return %c0_i32, %c0_i32_0 : i32, i32
  }
  func.func @transform_7(%arg0: i32) -> (i32, i32) {
    %c0_i32 = arith.constant 0 : i32
    %c0_i32_0 = arith.constant 0 : i32
    return %arg0, %c0_i32 : i32, i32
  }
}

</mosaic_0001>

<bundles_post_ra>
// kernel: mlp_forward.1
= control target key start
LH: loop header
LB: loop body
LE: loop exit
PB: predicated region body
PF: predicated region fallthrough
CT: control target
= control target key end

     0   :  { %v517_v0 = vmov 0.0   ;;  %vm518_vm0 = vmmov 0   ;;  %s676_s1 = inlined_call_operand.vmem [shape: bf16[128,128], index: 1, kind: input, shape index: {}]   ;;  %s677_s3 = inlined_call_operand.vmem [shape: bf16[128,128], index: 3, kind: input, shape index: {}]   ;;  %s678_s0 = inlined_call_operand.vmem [shape: bf16[8,128], index: 0, kind: input, shape index: {}]   ;;  %s679_s5 = inlined_call_operand.vmem [shape: bf16[128,128], index: 5, kind: input, shape index: {}]   ;;  %s680_s2 = inlined_call_operand.vmem [shape: f32[1,128], index: 2, kind: input, shape index: {}]   ;;  %s681_s4 = inlined_call_operand.vmem [shape: f32[1,128], index: 4, kind: input, shape index: {}]   ;;  %s682_s6 = inlined_call_operand.vmem [shape: f32[1,128], index: 6, kind: input, shape index: {}]   ;;  %s683_s7 = inlined_call_operand.vmem [shape: f32[8,128], index: 7, kind: output, shape index: {}]  }
   0x1   :  { %429 = vmatprep.subr.bf16.mxu0 %v517_v0  ;;  %v491_v1 = vld [vmem:[%s676_s1] sm:$0xff]   ;;  %445 = vmatprep.mubr.msk.bf16.mxu0 %vm518_vm0, %v517_v0  ;;  %v492_v2 = vld [vmem:[%s676_s1 + $0x8] sm:$0xff]   ;;  %v493_v3 = vld [vmem:[%s676_s1 + $0x10] sm:$0xff]  }
   0x2   :  { %449 = vmatprep.subr.bf16.mxu1 %v517_v0  ;;  %465 = vmatprep.mubr.msk.bf16.mxu1 %vm518_vm0, %v517_v0  ;;  %v499_v4 = vld [vmem:[%s677_s3] sm:$0xff]   ;;  %v494_v5 = vld [vmem:[%s676_s1 + $0x18] sm:$0xff]   ;;  %v500_v6 = vld [vmem:[%s677_s3 + $0x8] sm:$0xff]  }
   0x3   :  { %430 = vmatpush3.bf16.msra.mxu0 %v491_v1  ;;  %450 = vmatpush3.bf16.msra.mxu1 %v499_v4  ;;  %v495_v7 = vld [vmem:[%s676_s1 + $0x20] sm:$0xff]   ;;  %v501_v8 = vld [vmem:[%s677_s3 + $0x10] sm:$0xff]   ;;  %v496_v9 = vld [vmem:[%s676_s1 + $0x28] sm:$0xff]  }
   0x4   :  { %431 = vmatprep.subr.bf16.mxu0 %v517_v0  ;;  %451 = vmatprep.subr.bf16.mxu1 %v517_v0  ;;  %v502_v10 = vld [vmem:[%s677_s3 + $0x18] sm:$0xff]   ;;  %v497_v11 = vld [vmem:[%s676_s1 + $0x30] sm:$0xff]   ;;  %v503_v12 = vld [vmem:[%s677_s3 + $0x20] sm:$0xff]  }
   0x5   :  { %v498_v13 = vld [vmem:[%s676_s1 + $0x38] sm:$0xff]   ;;  %v504_v14 = vld [vmem:[%s677_s3 + $0x28] sm:$0xff]   ;;  %v27_v15 = vld [vmem:[%s678_s0] sm:$0xf] }
   0x6   :  { %v505_v16 = vld [vmem:[%s677_s3 + $0x30] sm:$0xff]   ;;  %v506_v17 = vld [vmem:[%s677_s3 + $0x38] sm:$0xff]   ;;  %v507_v18 = vld [vmem:[%s679_s5] sm:$0xff]  }
   0x7   :  { %432 = vmatpush3.bf16.msra.mxu0 %v492_v2  ;;  %452 = vmatpush3.bf16.msra.mxu1 %v500_v6  ;;  %v508_v19 = vld [vmem:[%s679_s5 + $0x8] sm:$0xff]   ;;  %v509_v20 = vld [vmem:[%s679_s5 + $0x10] sm:$0xff]   ;;  %v510_v21 = vld [vmem:[%s679_s5 + $0x18] sm:$0xff]  }
   0x8   :  { %433 = vmatprep.subr.bf16.mxu0 %v517_v0  ;;  %453 = vmatprep.subr.bf16.mxu1 %v517_v0  ;;  %v511_v22 = vld [vmem:[%s679_s5 + $0x20] sm:$0xff]   ;;  %v512_v23 = vld [vmem:[%s679_s5 + $0x28] sm:$0xff]   ;;  %v513_v32 = vld [vmem:[%s679_s5 + $0x30] sm:$0xff]  }
   0x9   :  { %v375_v24 = vld [vmem:[%s680_s2] ss:$0 sm:$0xff]  ;;  %v514_v33 = vld [vmem:[%s679_s5 + $0x38] sm:$0xff]  }
   0xa   :  { %v384_v34 = vld [vmem:[%s681_s4] ss:$0 sm:$0xff] }
   0xb   :  { %434 = vmatpush3.bf16.msra.mxu0 %v493_v3  ;;  %454 = vmatpush3.bf16.msra.mxu1 %v501_v8  ;;  %v393_v42 = vld [vmem:[%s682_s6] ss:$0 sm:$0xff] }
   0xc   :  { %435 = vmatprep.subr.bf16.mxu0 %v517_v0  ;;  %455 = vmatprep.subr.bf16.mxu1 %v517_v0 }
   0xf   :  { %436 = vmatpush3.bf16.msra.mxu0 %v494_v5  ;;  %456 = vmatpush3.bf16.msra.mxu1 %v502_v10 }
  0x10   :  { %437 = vmatprep.subr.bf16.mxu0 %v517_v0  ;;  %457 = vmatprep.subr.bf16.mxu1 %v517_v0 }
  0x13   :  { %438 = vmatpush3.bf16.msra.mxu0 %v495_v7  ;;  %458 = vmatpush3.bf16.msra.mxu1 %v503_v12 }
  0x14   :  { %439 = vmatprep.subr.bf16.mxu0 %v517_v0  ;;  %459 = vmatprep.subr.bf16.mxu1 %v517_v0 }
  0x17   :  { %440 = vmatpush3.bf16.msra.mxu0 %v496_v9  ;;  %460 = vmatpush3.bf16.msra.mxu1 %v504_v14 }
  0x18   :  { %441 = vmatprep.subr.bf16.mxu0 %v517_v0  ;;  %461 = vmatprep.subr.bf16.mxu1 %v517_v0 }
  0x1b   :  { %442 = vmatpush3.bf16.msra.mxu0 %v497_v11  ;;  %462 = vmatpush3.bf16.msra.mxu1 %v505_v16 }
  0x1c   :  { %443 = vmatprep.subr.bf16.mxu0 %v517_v0  ;;  %463 = vmatprep.subr.bf16.mxu1 %v517_v0 }
  0x1f   :  { %444 = vmatpush3.bf16.msra.mxu0 %v498_v13  ;;  %464 = vmatpush3.bf16.msra.mxu1 %v506_v17 }
  0x20   :  { %469 = vmatprep.subr.bf16.mxu0 %v517_v0 }
  0x22   :  { %446 = vmatmul.mubr.bf16.vlgmr.msra.gmra.mrb[0].mxu0 %v27_v15 }
  0x23   :  { %485 = vmatprep.mubr.msk.bf16.mxu0 %vm518_vm0, %v517_v0  ;;  %470 = vmatpush3.bf16.msra.mxu0 %v507_v18 }
  0x24   :  { %471 = vmatprep.subr.bf16.mxu0 %v517_v0 }
  0x27   :  { %472 = vmatpush3.bf16.msra.mxu0 %v508_v19 }
  0x28   :  { %473 = vmatprep.subr.bf16.mxu0 %v517_v0 }
  0x2b   :  { %474 = vmatpush3.bf16.msra.mxu0 %v509_v20 }
  0x2c   :  { %475 = vmatprep.subr.bf16.mxu0 %v517_v0 }
  0x2f   :  { %476 = vmatpush3.bf16.msra.mxu0 %v510_v21 }
  0x30   :  { %477 = vmatprep.subr.bf16.mxu0 %v517_v0 }
  0x33   :  { %478 = vmatpush3.bf16.msra.mxu0 %v511_v22 }
  0x34   :  { %479 = vmatprep.subr.bf16.mxu0 %v517_v0 }
  0x37   :  { %480 = vmatpush3.bf16.msra.mxu0 %v512_v23 }
  0x38   :  { %481 = vmatprep.subr.bf16.mxu0 %v517_v0 }
  0x3b   :  { %482 = vmatpush3.bf16.msra.mxu0 %v513_v32 }
  0x3c   :  { %483 = vmatprep.subr.bf16.mxu0 %v517_v0 }
  0x3f   :  { %484 = vmatpush3.bf16.msra.mxu0 %v514_v33 }
  0xf5   :  { %v133_v25 = vpop.f32.mrb[0].mxu0 }
  0xf6   :  { %v134_v26 = vadd.f32 %v375_v24, %v133_v25  ;;  %v447_v27 = vpop.f32.mrb[1].mxu0 }
  0xf7   :  { %v136_v28 = vpop.f32.mrb[2].mxu0 }
  0xf8   :  { %v139_v29 = vmax.f32 %v134_v26, 0.0  ;;  %v448_v30 = vpop.f32.mrb[3].mxu0 }
  0xfa   :  { %v142_v31 = vpack.c.bf16 %v139_v29, %v139_v29 }
  0xfc   :  { %466 = vmatmul.mubr.bf16.vlgmr.msra.gmra.mrb[0].mxu1 %v142_v31 }
 0x1cf   :  { %v248_v35 = vpop.f32.mrb[0].mxu1 }
 0x1d0   :  { %v249_v36 = vadd.f32 %v384_v34, %v248_v35  ;;  %v467_v37 = vpop.f32.mrb[1].mxu1 }
 0x1d1   :  { %v251_v38 = vpop.f32.mrb[2].mxu1 }
 0x1d2   :  { %v254_v39 = vmax.f32 %v249_v36, 0.0  ;;  %v468_v40 = vpop.f32.mrb[3].mxu1 }
 0x1d4   :  { %v257_v41 = vpack.c.bf16 %v254_v39, %v254_v39 }
 0x1d6   :  { %486 = vmatmul.mubr.bf16.vlgmr.msra.gmra.mrb[4].mxu0 %v257_v41 }
 0x2a9   :  { %v363_v43 = vpop.f32.mrb[4].mxu0 }
 0x2aa   :  { %v364_v44 = vadd.f32 %v393_v42, %v363_v43  ;;  %v487_v45 = vpop.f32.mrb[5].mxu0 }
 0x2ab   :  { %v366_v46 = vpop.f32.mrb[6].mxu0 }
 0x2ac   :  { %515 = vtanh.f32 %v364_v44  ;;  %v488_v47 = vpop.f32.mrb[7].mxu0 }
 0x2b6   :  { %v516_v48 = vpop.eup %515 }
 0x2b7   :  { %370 = vst [vmem:[%s683_s7] sm:$0xff] %v516_v48 }

</bundles_post_ra>
